<compile_context>
chip_gen: v5e
topology: v5e:2x2
jax: 0.10.0
libtpu: 0.0.40
codegen_flags: <defaults>
</compile_context>

<pallas_src>
import functools

import jax
import jax.numpy as jnp
from jax.experimental import pallas as pl
from jax.experimental.pallas import tpu as pltpu


def _eca_kernel(x_ref, w_ref, o_ref, *, inv_hw, rows):
    # x_ref: (rows, HW)   w_ref: (Rp, 1) resident   o_ref: (rows, HW)
    r0 = pl.multiple_of(pl.program_id(0) * rows, rows)

    # Global average pool: lane-axis sum accumulated in f32 (exact for bf16 x,
    # no full-tile f32 temporary kept live across the reduction).
    pooled = jnp.sum(x_ref[...], axis=-1, keepdims=True, dtype=jnp.float32)
    pooled = pooled * inv_hw                                        # (rows, 1) f32

    # Depthwise KxK conv on a 1x1 spatial map with pad=K//2 == center-tap mul.
    w = w_ref[pl.ds(r0, rows), :]                                   # (rows, 1) f32
    scale = jax.nn.sigmoid(pooled * w)                              # (rows, 1) f32

    # Final scale in x's dtype (bf16 multiply on v6e/v7x halves VPU/vst traffic;
    # f32 inputs stay f32).  Broadcast over lanes.
    o_ref[...] = (x_ref[...] * scale.astype(x_ref.dtype)).astype(o_ref.dtype)


def eca_forward(x, conv_weight, *, target_block_bytes=2 * 1024 * 1024):
    """x: (B, C, H, W);  conv_weight: (C, 1, K, K) depthwise Conv2d weight."""
    B, C, H, W = x.shape
    K = conv_weight.shape[-1]
    assert K % 2 == 1, "ECA center-tap reduction requires an odd kernel_size"
    HW = H * W
    R = B * C

    # Center tap of each per-channel KxK kernel (the only tap that touches
    # non-padded data for a 1x1 spatial input with padding=K//2).
    w_center = conv_weight[:, 0, K // 2, K // 2].astype(jnp.float32)    # (C,)

    # Row view (free reshape of a contiguous array): rows -> sublanes, HW -> lanes.
    x2 = x.reshape(R, HW)

    # ---- row-tile selection -------------------------------------------------
    itemsize = jnp.dtype(x.dtype).itemsize
    row_bytes = HW * itemsize
    rows_by_bytes = max(8, (max(1, target_block_bytes // row_bytes) // 8) * 8)
    rows_for_steps = max(8, ((R // 4) // 8) * 8)     # keep >= ~4 grid steps when possible
    r_ceil8 = ((R + 7) // 8) * 8
    rows = min(rows_by_bytes, rows_for_steps, r_ceil8)

    num_steps = pl.cdiv(R, rows)
    Rp = num_steps * rows

    # Per-row weight column (row r = b*C + c uses w_center[c]); tiny (Rp*4 B),
    # padded to Rp so the in-kernel slice of the resident buffer never goes OOB.
    w_rows = jnp.tile(w_center, B)                                      # (R,)
    w_col = jnp.pad(w_rows, (0, Rp - R)).reshape(Rp, 1)

    # ---- VMEM budget (2 input + 2 output double-buffers + resident weights) --
    block_bytes = rows * row_bytes
    pipeline_bytes = 4 * block_bytes + 2 * Rp * 4 + (1 << 20)
    compiler_kwargs = {}
    if pipeline_bytes > (12 << 20):       # above v5e's 16 MiB default comfort zone
        compiler_kwargs["vmem_limit_bytes"] = int(min(64 << 20, pipeline_bytes))

    kernel = functools.partial(_eca_kernel, inv_hw=float(1.0 / HW), rows=rows)

    out2 = pl.pallas_call(
        kernel,
        out_shape=jax.ShapeDtypeStruct((R, HW), x.dtype),
        grid_spec=pltpu.PrefetchScalarGridSpec(
            num_scalar_prefetch=0,
            grid=(num_steps,),
            in_specs=[
                # last block dim == full HW extent (exempt from the 128 rule);
                # ragged last row tile handled by Pallas boundary masking.
                pl.BlockSpec((rows, HW), lambda r: (r, 0)),
                # whole weight column, constant block index -> fetched once, resident.
                pl.BlockSpec((Rp, 1), lambda r: (0, 0)),
            ],
            out_specs=pl.BlockSpec((rows, HW), lambda r: (r, 0)),
        ),
        compiler_params=pltpu.CompilerParams(
            dimension_semantics=("parallel",), **compiler_kwargs),
        cost_estimate=pl.CostEstimate(
            flops=2 * R * HW,
            transcendentals=R,
            bytes_accessed=2 * R * HW * itemsize + R * 4),
    )(x2, w_col)

    return out2.reshape(B, C, H, W)


def eca_reference(x, conv_weight):
    """Plain-JAX reference with identical semantics (for validation)."""
    K = conv_weight.shape[-1]
    pooled = jnp.mean(x, axis=(2, 3))                            # (B, C)
    w_center = conv_weight[:, 0, K // 2, K // 2]                 # (C,)
    scale = jax.nn.sigmoid(pooled * w_center[None, :])           # (B, C)
    return x * scale[:, :, None, None]


if __name__ == "__main__":
    B, C, H, W = 2, 4, 16, 16
    K = 3

    key = jax.random.PRNGKey(0)
    kx, kw = jax.random.split(key)
    x = jax.random.normal(kx, (B, C, H, W), dtype=jnp.float32)
    # Depthwise Conv2d weight, shape (C, 1, K, K), groups=C, bias=False.
    conv_weight = jax.random.normal(kw, (C, 1, K, K), dtype=jnp.float32) * 0.1

    out = eca_forward(x, conv_weight)
    out = jax.block_until_ready(out)

    ref = eca_reference(x, conv_weight)
    assert out.shape == (B, C, H, W)
    assert jnp.allclose(out, ref, atol=1e-5, rtol=1e-5), "mismatch vs reference"

    print("KERNEL_OK")
</pallas_src>

<mosaic_0001>
module attributes {stable_mosaic.version = 11 : i64} {
  func.func @_eca_kernel(%arg0: i32, %arg1: memref<8x256xf32, #tpu.memory_space<vmem>>, %arg2: memref<8x1xf32, #tpu.memory_space<vmem>>, %arg3: memref<8x256xf32, #tpu.memory_space<vmem>>) attributes {dimension_semantics = [#tpu.dimension_semantics<parallel>], iteration_bounds = array<i64: 1>, scalar_prefetch = 0 : i64, scratch_operands = 0 : i64, tpu.core_type = #tpu.core_type<tc>, window_params = [{transform_indices = @transform_0, window_bounds = array<i64: 8, 256>}, {pipeline_mode = #tpu.pipeline_mode<synchronous>, transform_indices = @transform_1, window_bounds = array<i64: 8, 1>}, {transform_indices = @transform_2, window_bounds = array<i64: 8, 256>}]} {
    %c8_i32 = arith.constant 8 : i32
    %0 = arith.muli %arg0, %c8_i32 : i32
    %1 = tpu.assume_multiple %0, 8 : i32
    %c0 = arith.constant 0 : index
    %c0_0 = arith.constant 0 : index
    %2 = vector.load %arg1[%c0, %c0_0] : memref<8x256xf32, #tpu.memory_space<vmem>>, vector<8x256xf32>
    %cst = arith.constant dense<0.000000e+00> : vector<8xf32>
    %3 = vector.multi_reduction <add>, %2, %cst [1] : vector<8x256xf32> to vector<8xf32>
    %4 = vector.shape_cast %3 : vector<8xf32> to vector<8x1xf32>
    %cst_1 = arith.constant 3.906250e-03 : f32
    %5 = vector.broadcast %cst_1 : f32 to vector<8x1xf32>
    %6 = arith.mulf %4, %5 : vector<8x1xf32>
    %7 = arith.index_cast %1 : i32 to index
    %c0_2 = arith.constant 0 : index
    %8 = vector.load %arg2[%7, %c0_2] : memref<8x1xf32, #tpu.memory_space<vmem>>, vector<8x1xf32>
    %9 = arith.mulf %6, %8 : vector<8x1xf32>
    %10 = arith.negf %9 : vector<8x1xf32>
    %11 = math.exp %10 : vector<8x1xf32>
    %cst_3 = arith.constant 1.000000e+00 : f32
    %12 = vector.broadcast %cst_3 : f32 to vector<8x1xf32>
    %13 = arith.addf %12, %11 : vector<8x1xf32>
    %14 = arith.divf %12, %13 : vector<8x1xf32>
    %c0_4 = arith.constant 0 : index
    %c0_5 = arith.constant 0 : index
    %15 = vector.load %arg1[%c0_4, %c0_5] : memref<8x256xf32, #tpu.memory_space<vmem>>, vector<8x256xf32>
    %16 = vector.broadcast %14 : vector<8x1xf32> to vector<8x256xf32>
    %17 = arith.mulf %15, %16 : vector<8x256xf32>
    %c0_6 = arith.constant 0 : index
    %c0_7 = arith.constant 0 : index
    %18 = vector.load %arg3[%c0_6, %c0_7] : memref<8x256xf32, #tpu.memory_space<vmem>>, vector<8x256xf32>
    tpu.vector_store %arg3[%c0_6, %c0_7], %17 {strides = array<i32>} : memref<8x256xf32, #tpu.memory_space<vmem>>, vector<8x256xf32>,
    return
  }
  func.func @transform_0(%arg0: i32) -> (i32, i32) {
    %c0_i32 = arith.constant 0 : i32
    %c0_i32_0 = arith.constant 0 : i32
    return %arg0, %c0_i32 : i32, i32
  }
  func.func @transform_1(%arg0: i32) -> (i32, i32) {
    %c0_i32 = arith.constant 0 : i32
    %c0_i32_0 = arith.constant 0 : i32
    %c0_i32_1 = arith.constant 0 : i32
    return %c0_i32, %c0_i32_0 : i32, i32
  }
  func.func @transform_2(%arg0: i32) -> (i32, i32) {
    %c0_i32 = arith.constant 0 : i32
    %c0_i32_0 = arith.constant 0 : i32
    return %arg0, %c0_i32 : i32, i32
  }
}

</mosaic_0001>

<bundles_post_ra>
// kernel: tpu_custom_call.1
= control target key start
LH: loop header
LB: loop body
LE: loop exit
PB: predicated region body
PF: predicated region fallthrough
CT: control target
= control target key end

     0   :  { %7 = vsyncpa [#allocation3], 0  ;;  %s169_s0 = inlined_call_operand.hbm [shape: f32[8,256], index: 0, kind: input, shape index: {}]   ;;  %s170_s1 = inlined_call_operand.vmem [shape: f32[8,1], index: 1, kind: input, shape index: {}]   ;;  %s171_s2 = inlined_call_operand.hbm [shape: f32[8,256], index: 2, kind: output, shape index: {}]  }
   0x1   :  { %8 = vsyncpa [#allocation4], 0  ;;  %s14_s11 = sshll.u32 %s169_s0, 4  ;;  %s142_s12 = smov [#allocation2]   ;;  %s15_s11 = int_to_ptr.hbm [resolvable:$true] %s14_s11 }
   0x2   :  { %s16_s13 = sshll.u32 %s142_s12, 4  ;;  %s17_s13 = int_to_ptr.vmem [resolvable:$true] %s16_s13 }
   0x3   :  { %19 = dma.hbm_to_vmem [thread:$0]  %s15_s11, 256, %s17_s13, [#allocation3]  }
   0x4   :  { %138 = dma.done.wait [#allocation3], 256  }
   0x5   :  { %139 = vsyncadd [#allocation3], 4294967040  ;;  %v27_v0 = vld [vmem:[#allocation2] sm:$0xff]  ;;  %v28_v1 = vld [vmem:[#allocation2 + $0x8] sm:$0xff]  ;;  %v143_v3 = vmov 0   ;;  %s144_s0 = smov [#allocation5]  }
   0x6   :  { %v29_v2 = vadd.f32 %v28_v1, %v27_v0  ;;  %85 = vset.pattern.permute.xlu0 %v143_v3  ;;  %v34_v4 = vld [vmem:[%s170_s1] sm:$0xff]  ;;  %s69_s1 = sshll.u32 %s144_s0, 4  ;;  %s71_s18 = sshll.u32 %s171_s2, 4  ;;  %s70_s1 = int_to_ptr.vmem [resolvable:$true] %s69_s1  ;;  %s72_s18 = int_to_ptr.hbm [resolvable:$true] %s71_s18 }
   0x8   :  { %30 = vadd.xlane.f32.xlu0 %v29_v2 }
  0x7b   :  { %v31_v5 = vpop.xlane.xlu0 %30 }
  0x7c   :  { %v32_v6 = vmul.f32 0.00390625, %v31_v5 }
  0x7e   :  { %v35_v7 = vmul.f32 %v34_v4, %v32_v6 }
  0x80   :  { %v81_v8 = vmul.f32 -1.442695, %v35_v7 }
  0x82   :  { %86 = vpow2.f32 %v81_v8 }
  0x88   :  { %v87_v9 = vpop.eup %86 }
  0x89   :  { %v39_v10 = vadd.f32 1.0, %v87_v9 }
  0x8b   :  { %88 = vrcp.f32 %v39_v10  ;;  %v51_v14 = vand.u32 2147483648, %v39_v10  ;;  %v49_v16 = vand.u32 2147483647, %v39_v10  ;;  %vm45_vm1 = vweird.f32 %v39_v10 }
  0x8d   :  { %v52_v18 = vor.u32 1.1754944e-38, %v51_v14  ;;  %vm50_vm3 = vcmp.eq.f32.partialorder %v49_v16, 8.507059e+37 }
  0x91   :  { %v89_v11 = vpop.eup %88 }
  0x92   :  { %v41_v12 = vmul.f32 %v89_v11, %v39_v10  ;;  %vm46_vm0 = vweird.f32 %v89_v11 }
  0x93   :  { %vm47_vm2 = vmor %vm45_vm1, %vm46_vm0 }
  0x94   :  { %v42_v13 = vsub.f32 1.0, %v41_v12 }
  0x96   :  { %v43_v15 = vmul.f32 %v89_v11, %v42_v13 }
  0x98   :  { %v44_v17 = vadd.f32 %v89_v11, %v43_v15 }
  0x9a   :  { %v48_v19 = vsel %vm47_vm2, %v89_v11, %v44_v17 }
  0x9b   :  { %v53_v20 = vsel %vm50_vm3, %v52_v18, %v48_v19 }
  0x9c   :  { %57 = vperm.xlu0 %85, %v53_v20  }
 0x10e   :  { %v58_v21 = vpop.permute.xlu0 %57 }
 0x10f   :  { %v60_v22 = vmul.f32 %v58_v21, %v27_v0  ;;  %v61_v23 = vmul.f32 %v58_v21, %v28_v1 }
 0x111   :  { %62 = vst [vmem:[#allocation5] sm:$0xff] %v60_v22 }
 0x112   :  { %63 = vst [vmem:[#allocation5 + $0x8] sm:$0xff] %v61_v23 }
 0x113   :  { %74 = dma.vmem_to_hbm [thread:$0]  %s70_s1, 256, %s72_s18, [#allocation4]  }
 0x114   :  { %140 = dma.done.wait [#allocation4], 256  }
 0x115   :  { %141 = vsyncadd [#allocation4], 4294967040 }
 0x116   :  { %79 = vsyncpa [#allocation3], 1 }
 0x117   :  { %80 = vsyncpa [#allocation4], 1 }

</bundles_post_ra>
